<compile_context>
chip_gen: v5e
topology: v5e:2x2
jax: 0.10.0
libtpu: 0.0.40
codegen_flags: <defaults>
</compile_context>

<pallas_src>
import functools
import math

import jax
import jax.numpy as jnp
from jax import lax
from jax.experimental import pallas as pl
from jax.experimental.pallas import tpu as pltpu

_LANES = 128


# ----------------------------- Pallas kernel ---------------------------------
def _layernorm_kernel(x_ref, alpha_ref, bias_ref, o_ref, *, eps: float,
                      n_feat: int, f_padded: int):
    """LayerNorm over the last axis, matching the torch reference:
       alpha * (x - mean) / (std + eps) + bias, std with ddof=1 (unbiased), two-pass."""
    n = jnp.float32(n_feat)
    needs_mask = f_padded != n_feat      # static: feature axis was zero-padded to 128 lanes

    # ---- pass 1: mean -------------------------------------------------------
    x = x_ref[...].astype(jnp.float32)                         # (TM, Fp)
    if needs_mask:
        col = lax.broadcasted_iota(jnp.int32, x.shape, 1)
        valid = col < n_feat
        x = jnp.where(valid, x, 0.0)
    mean = jnp.sum(x, axis=-1, keepdims=True) * (1.0 / n)      # (TM, 1)

    # ---- pass 2: re-read x from VMEM (3 vld/cycle, cheap) so the pass-1 f32 copy
    # does not have to stay live; halves the in-kernel f32 footprint.
    xb = x_ref[...].astype(jnp.float32)
    d = xb - mean
    if needs_mask:
        d = jnp.where(valid, d, 0.0)                           # padded cols contribute 0
    ddof = jnp.float32(max(n_feat - 1, 1))                     # guard features == 1
    var = jnp.sum(d * d, axis=-1, keepdims=True) / ddof
    std = jnp.sqrt(var)

    # Per-row (TM,1) reciprocal; exact (approx=False) to keep bit-level parity with the
    # reference — at this shape the cost difference vs the approx EUP path is negligible.
    inv = pl.reciprocal(std + jnp.float32(eps), approx=False)

    y = d * inv * alpha_ref[...] + bias_ref[...]               # padded cols: alpha=bias=0 -> 0
    o_ref[...] = y.astype(o_ref.dtype)


# --------------------------- tile-size selection ------------------------------
def _sublane_quantum(dtype) -> int:
    itemsize = jnp.dtype(dtype).itemsize
    return max(8, 32 // max(1, itemsize))      # 8 for f32, 16 for bf16, 32 for int8/fp8


def _vmem_limit_bytes() -> int:
    try:
        cap = int(pltpu.get_tpu_info().vmem_capacity_bytes)
    except Exception:
        cap = 64 * 1024 * 1024                 # conservative (v7x-sized) fallback
    # 48 MiB scoped on v7x (64 MiB physical), up to 96 MiB on 128 MiB parts.
    return min(int(cap * 0.75), 96 * 1024 * 1024)


def _pick_grid(rows: int, f_pad: int, dtype, vmem_limit: int):
    """Returns (row_tile, num_blocks)."""
    q = _sublane_quantum(dtype)
    itemsize = jnp.dtype(dtype).itemsize
    # Per-row VMEM bytes:
    #   2x double-buffered input + 2x double-buffered output tiles (native dtype)
    #   + ~2 live f32 row-copies for the in-kernel working set (x is re-read from the VMEM
    #     ref between phases, so the reduction copy and the normalize copy do not stack).
    per_row = (2 + 2) * f_pad * itemsize + 2 * 4 * f_pad
    budget = int(vmem_limit * 0.8)
    tile_cap = max(q, (budget // per_row) // q * q)

    rows_q = ((rows + q - 1) // q) * q
    # Target 512-1024-row tiles: already ~85-86% of HBM roofline, while keeping >= 4 grid
    # steps on large tensors so prologue/epilogue DMAs stay hidden behind compute.
    tile = min(tile_cap, 1024, rows_q)
    tile = max(q, (tile // q) * q)
    num_blocks = pl.cdiv(rows, tile)

    if num_blocks > 1:
        # Near-equal tiles; keep the step count even where possible so v7x's two TensorCores
        # get balanced work from the "parallel" grid axis.
        if num_blocks % 2 == 1:
            num_blocks += 1
        tile = ((pl.cdiv(rows, num_blocks) + q - 1) // q) * q
        tile = max(q, min(tile, tile_cap))
        num_blocks = pl.cdiv(rows, tile)
    return tile, num_blocks


# ------------------------------ wrapper ---------------------------------------
def layer_norm_pallas(x: jax.Array, alpha: jax.Array, bias: jax.Array,
                      eps: float = 1e-6) -> jax.Array:
    """x: (..., F). Normalizes over the last dim with a Pallas TPU kernel."""
    orig_shape = x.shape
    f = orig_shape[-1]
    rows = int(math.prod(orig_shape[:-1])) if len(orig_shape) > 1 else 1
    x2 = x.reshape(rows, f)
    itemsize = jnp.dtype(x.dtype).itemsize

    # Lane-dense feature axis: pad F up to a multiple of 128 so loads/stores are full-lane
    # (unmasked vst). Padded columns carry alpha = bias = 0 and are masked out of the stats.
    f_pad = ((f + _LANES - 1) // _LANES) * _LANES
    padded = f_pad != f
    if padded:
        x2 = jnp.pad(x2, ((0, 0), (0, f_pad - f)))
    alpha2 = alpha.reshape(1, f).astype(jnp.float32)           # pre-cast once, VMEM-resident
    bias2 = bias.reshape(1, f).astype(jnp.float32)
    if padded:
        alpha2 = jnp.pad(alpha2, ((0, 0), (0, f_pad - f)))
        bias2 = jnp.pad(bias2, ((0, 0), (0, f_pad - f)))

    vmem_limit = _vmem_limit_bytes()
    row_tile, num_blocks = _pick_grid(rows, f_pad, x.dtype, vmem_limit)

    # Optional deeper input pipelining on big-VMEM parts (v5e/v6e) with a real multi-step grid.
    x_spec = pl.BlockSpec((row_tile, f_pad), lambda i: (i, 0))
    tile_bytes = row_tile * f_pad * itemsize
    ws_bytes = 2 * 4 * row_tile * f_pad
    deep_ok = (num_blocks >= 4
               and vmem_limit >= 80 * 1024 * 1024
               and (3 * tile_bytes + 2 * tile_bytes + ws_bytes) <= int(vmem_limit * 0.8))
    if deep_ok and hasattr(pl, "Buffered"):
        try:
            x_spec = pl.BlockSpec((row_tile, f_pad), lambda i: (i, 0),
                                  pipeline_mode=pl.Buffered(3))
        except TypeError:
            pass  # older API: fall back to the default double buffer

    out = pl.pallas_call(
        functools.partial(_layernorm_kernel, eps=eps, n_feat=f, f_padded=f_pad),
        out_shape=jax.ShapeDtypeStruct((rows, f_pad), x.dtype),
        grid_spec=pltpu.PrefetchScalarGridSpec(
            num_scalar_prefetch=0,
            grid=(num_blocks,),
            in_specs=[
                x_spec,                                         # x tile
                pl.BlockSpec((1, f_pad), lambda i: (0, 0)),     # alpha (broadcast, resident)
                pl.BlockSpec((1, f_pad), lambda i: (0, 0)),     # bias  (broadcast, resident)
            ],
            out_specs=pl.BlockSpec((row_tile, f_pad), lambda i: (i, 0)),
        ),
        input_output_aliases={0: 0},                            # x buffer is dead after the call
        compiler_params=pltpu.CompilerParams(
            dimension_semantics=("parallel",),                  # shards across v7x's 2 TCs
            vmem_limit_bytes=vmem_limit,
        ),
        cost_estimate=pl.CostEstimate(
            flops=10 * rows * f_pad,
            transcendentals=2 * rows,                           # sqrt + reciprocal per row
            bytes_accessed=2 * rows * f_pad * itemsize,
        ),
    )(x2, alpha2, bias2)

    if padded:
        out = out[:, :f]
    return out.reshape(orig_shape)


# ------------------------------- Decoder --------------------------------------
class Decoder:
    """JAX mirror of the PyTorch Decoder: loop over layers, then LayerNormalization."""

    def __init__(self, features: int, layers, eps: float = 1e-6):
        self.layers = list(layers)      # each: fn(x, encoder_output, src_mask, tgt_mask) -> x
        self.eps = eps
        # nn.Parameter(torch.ones/zeros(features))
        self.alpha = jnp.ones((features,), dtype=jnp.float32)
        self.bias = jnp.zeros((features,), dtype=jnp.float32)

    def __call__(self, x, encoder_output, src_mask, tgt_mask):
        for layer in self.layers:
            x = layer(x, encoder_output, src_mask, tgt_mask)
        return layer_norm_pallas(x, self.alpha, self.bias, eps=self.eps)


# ------------------------------ reference -------------------------------------
def _layer_norm_ref(x, alpha, bias, eps):
    mean = jnp.mean(x, axis=-1, keepdims=True)
    std = jnp.std(x, axis=-1, keepdims=True, ddof=1)   # torch's unbiased std
    return alpha * (x - mean) / (std + eps) + bias


if __name__ == "__main__":
    key = jax.random.PRNGKey(0)
    batch, seq, features = 2, 8, 32
    kx, ke = jax.random.split(key)

    x = jax.random.normal(kx, (batch, seq, features), dtype=jnp.float32)
    encoder_output = jax.random.normal(ke, (batch, seq, features), dtype=jnp.float32)
    src_mask = jnp.ones((batch, 1, 1, seq), dtype=jnp.float32)
    tgt_mask = jnp.ones((batch, 1, seq, seq), dtype=jnp.float32)

    decoder = Decoder(features, layers=[])   # layers unspecified in reference -> empty stack
    out = decoder(x, encoder_output, src_mask, tgt_mask)
    out = jax.block_until_ready(out)

    ref = _layer_norm_ref(x, decoder.alpha, decoder.bias, decoder.eps)
    assert out.shape == x.shape
    assert jnp.allclose(out, ref, atol=1e-5, rtol=1e-5), "mismatch vs reference"

    print("KERNEL_OK")
</pallas_src>

<mosaic_0001>
module attributes {stable_mosaic.version = 11 : i64} {
  func.func @_layernorm_kernel(%arg0: i32, %arg1: memref<16x128xf32, #tpu.memory_space<vmem>>, %arg2: memref<1x128xf32, #tpu.memory_space<vmem>>, %arg3: memref<1x128xf32, #tpu.memory_space<vmem>>, %arg4: memref<16x128xf32, #tpu.memory_space<vmem>>) attributes {dimension_semantics = [#tpu.dimension_semantics<parallel>], iteration_bounds = array<i64: 1>, scalar_prefetch = 0 : i64, scratch_operands = 0 : i64, tpu.core_type = #tpu.core_type<tc>, window_params = [{transform_indices = @transform_0, window_bounds = array<i64: 16, 128>}, {pipeline_mode = #tpu.pipeline_mode<synchronous>, transform_indices = @transform_1, window_bounds = array<i64: 1, 128>}, {pipeline_mode = #tpu.pipeline_mode<synchronous>, transform_indices = @transform_2, window_bounds = array<i64: 1, 128>}, {transform_indices = @transform_3, window_bounds = array<i64: 16, 128>}]} {
    %c0 = arith.constant 0 : index
    %c0_0 = arith.constant 0 : index
    %0 = vector.load %arg1[%c0, %c0_0] : memref<16x128xf32, #tpu.memory_space<vmem>>, vector<16x128xf32>
    %1 = tpu.iota {dimensions = array<i32: 1>} : vector<16x128xi32>
    %c32_i32 = arith.constant 32 : i32
    %2 = vector.broadcast %c32_i32 : i32 to vector<16x128xi32>
    %3 = arith.cmpi slt, %1, %2 : vector<16x128xi32>
    %cst = arith.constant 0.000000e+00 : f32
    %4 = vector.broadcast %cst : f32 to vector<16x128xf32>
    %5 = arith.select %3, %0, %4 : vector<16x128xi1>, vector<16x128xf32>
    %cst_1 = arith.constant dense<0.000000e+00> : vector<16xf32>
    %6 = vector.multi_reduction <add>, %5, %cst_1 [1] : vector<16x128xf32> to vector<16xf32>
    %7 = vector.shape_cast %6 : vector<16xf32> to vector<16x1xf32>
    %cst_2 = arith.constant 1.000000e+00 : f32
    %cst_3 = arith.constant 3.200000e+01 : f32
    %8 = arith.divf %cst_2, %cst_3 : f32
    %9 = vector.broadcast %8 : f32 to vector<16x1xf32>
    %10 = arith.mulf %7, %9 : vector<16x1xf32>
    %c0_4 = arith.constant 0 : index
    %c0_5 = arith.constant 0 : index
    %11 = vector.load %arg1[%c0_4, %c0_5] : memref<16x128xf32, #tpu.memory_space<vmem>>, vector<16x128xf32>
    %12 = vector.broadcast %10 : vector<16x1xf32> to vector<16x128xf32>
    %13 = arith.subf %11, %12 : vector<16x128xf32>
    %cst_6 = arith.constant 0.000000e+00 : f32
    %14 = vector.broadcast %cst_6 : f32 to vector<16x128xf32>
    %15 = arith.select %3, %13, %14 : vector<16x128xi1>, vector<16x128xf32>
    %16 = arith.mulf %15, %15 : vector<16x128xf32>
    %cst_7 = arith.constant dense<0.000000e+00> : vector<16xf32>
    %17 = vector.multi_reduction <add>, %16, %cst_7 [1] : vector<16x128xf32> to vector<16xf32>
    %18 = vector.shape_cast %17 : vector<16xf32> to vector<16x1xf32>
    %cst_8 = arith.constant 3.100000e+01 : f32
    %19 = vector.broadcast %cst_8 : f32 to vector<16x1xf32>
    %20 = arith.divf %18, %19 : vector<16x1xf32>
    %21 = math.sqrt %20 : vector<16x1xf32>
    %cst_9 = arith.constant 9.99999997E-7 : f32
    %22 = vector.broadcast %cst_9 : f32 to vector<16x1xf32>
    %23 = arith.addf %21, %22 : vector<16x1xf32>
    %24 = tpu.reciprocal %23 : vector<16x1xf32> -> vector<16x1xf32>
    %25 = vector.broadcast %24 : vector<16x1xf32> to vector<16x128xf32>
    %26 = arith.mulf %15, %25 : vector<16x128xf32>
    %c0_10 = arith.constant 0 : index
    %c0_11 = arith.constant 0 : index
    %27 = vector.load %arg2[%c0_10, %c0_11] : memref<1x128xf32, #tpu.memory_space<vmem>>, vector<1x128xf32>
    %28 = vector.broadcast %27 : vector<1x128xf32> to vector<16x128xf32>
    %29 = arith.mulf %26, %28 : vector<16x128xf32>
    %c0_12 = arith.constant 0 : index
    %c0_13 = arith.constant 0 : index
    %30 = vector.load %arg3[%c0_12, %c0_13] : memref<1x128xf32, #tpu.memory_space<vmem>>, vector<1x128xf32>
    %31 = vector.broadcast %30 : vector<1x128xf32> to vector<16x128xf32>
    %32 = arith.addf %29, %31 : vector<16x128xf32>
    %c0_14 = arith.constant 0 : index
    %c0_15 = arith.constant 0 : index
    %33 = vector.load %arg4[%c0_14, %c0_15] : memref<16x128xf32, #tpu.memory_space<vmem>>, vector<16x128xf32>
    tpu.vector_store %arg4[%c0_14, %c0_15], %32 {strides = array<i32>} : memref<16x128xf32, #tpu.memory_space<vmem>>, vector<16x128xf32>,
    return
  }
  func.func @transform_0(%arg0: i32) -> (i32, i32) {
    %c0_i32 = arith.constant 0 : i32
    %c0_i32_0 = arith.constant 0 : i32
    return %arg0, %c0_i32 : i32, i32
  }
  func.func @transform_1(%arg0: i32) -> (i32, i32) {
    %c0_i32 = arith.constant 0 : i32
    %c0_i32_0 = arith.constant 0 : i32
    %c0_i32_1 = arith.constant 0 : i32
    return %c0_i32, %c0_i32_0 : i32, i32
  }
  func.func @transform_2(%arg0: i32) -> (i32, i32) {
    %c0_i32 = arith.constant 0 : i32
    %c0_i32_0 = arith.constant 0 : i32
    %c0_i32_1 = arith.constant 0 : i32
    return %c0_i32, %c0_i32_0 : i32, i32
  }
  func.func @transform_3(%arg0: i32) -> (i32, i32) {
    %c0_i32 = arith.constant 0 : i32
    %c0_i32_0 = arith.constant 0 : i32
    return %arg0, %c0_i32 : i32, i32
  }
}

</mosaic_0001>

<bundles_post_ra>
// kernel: tpu_custom_call.1
= control target key start
LH: loop header
LB: loop body
LE: loop exit
PB: predicated region body
PF: predicated region fallthrough
CT: control target
= control target key end

     0   :  { %8 = vsyncpa [#allocation3], 0  ;;  %s278_s0 = inlined_call_operand.hbm [shape: f32[16,128], index: 0, kind: input, shape index: {}, may-alias: {0,3}]   ;;  %s279_s1 = inlined_call_operand.vmem [shape: f32[1,128], index: 1, kind: input, shape index: {}]   ;;  %s280_s2 = inlined_call_operand.vmem [shape: f32[1,128], index: 2, kind: input, shape index: {}]   ;;  %s281_s3 = inlined_call_operand.hbm [shape: f32[16,128], index: 3, kind: output, shape index: {}, may-alias: {0,3}]  }
   0x1   :  { %9 = vsyncpa [#allocation4], 0  ;;  %s14_s14 = sshll.u32 %s278_s0, 4  ;;  %s221_s15 = smov [#allocation2]   ;;  %s15_s14 = int_to_ptr.hbm [resolvable:$true] %s14_s14 }
   0x2   :  { %s16_s16 = sshll.u32 %s221_s15, 4  ;;  %s222_s17 = smov 128   ;;  %s17_s16 = int_to_ptr.vmem [resolvable:$true] %s16_s16 }
   0x3   :  { %s223_s18 = smov 8  }
   0x4   :  { %22 = dma.hbm_to_vmem [thread:$0]  %s15_s14, 256, %s17_s16, [#allocation3], %s222_s17, %s222_s17, %s223_s18  }
   0x5   :  { %217 = dma.done.wait [#allocation3], 256  }
   0x6   :  { %218 = vsyncadd [#allocation3], 4294967040  ;;  %v33_v0 = vlaneseq  ;;  %v31_v2 = vld [vmem:[#allocation2] sm:$0xff]  ;;  %v32_v4 = vld [vmem:[#allocation2 + $0x8] sm:$0xff]  ;;  %v224_v16 = vmov 31.0   ;;  %s139_s24 = sshll.u32 %s281_s3, 4  ;;  %s140_s24 = int_to_ptr.hbm [resolvable:$true] %s139_s24 }
   0x7   :  { %159 = vrcp.f32 %v224_v16  ;;  %v157_v60 = vld [vmem:[%s279_s1] ss:$0 sm:$0xff]  ;;  %s225_s1 = smov [#allocation5]  }
   0x8   :  { %v34_v1 = vand.u32 127, %v33_v0  ;;  %v158_v0 = vld [vmem:[%s280_s2] ss:$0 sm:$0xff]  ;;  %s137_s22 = sshll.u32 %s225_s1, 4  ;;  %s138_s22 = int_to_ptr.vmem [resolvable:$true] %s137_s22 }
   0xa   :  { %vm35_vm0 = vcmp.lt.s32.totalorder %v34_v1, 32 }
   0xb   :  { %v36_v3 = vsel %vm35_vm0, %v31_v2, 0.0  ;;  %v37_v5 = vsel %vm35_vm0, %v32_v4, 0.0 }
   0xc   :  { %38 = vadd.xlane.f32.xlu0 %v36_v3 }
   0xd   :  { %v160_v17 = vpop.eup %159 }
   0xe   :  { %v55_v18 = vmul.f32 31.0, %v160_v17  ;;  %vm59_vm1 = vweird.f32 %v160_v17 }
  0x10   :  { %v56_v19 = vsub.f32 1.0, %v55_v18 }
  0x12   :  { %v57_v20 = vmul.f32 %v160_v17, %v56_v19 }
  0x14   :  { %40 = vadd.xlane.f32.xlu0 %v37_v5  ;;  %v58_v21 = vadd.f32 %v160_v17, %v57_v20 }
  0x16   :  { %v60_v22 = vsel %vm59_vm1, %v160_v17, %v58_v21 }
  0x7f   :  { %v39_v6 = vpop.xlane.xlu0 %38 }
  0x80   :  { %v42_v7 = vmul.f32 0.03125, %v39_v6 }
  0x82   :  { %v44_v8 = vsub.f32 %v31_v2, %v42_v7 }
  0x84   :  { %v255_v9 = vsel %vm35_vm0, %v44_v8, 0.0 }
  0x85   :  { %v48_v10 = vmul.f32 %v255_v9, %v255_v9 }
  0x87   :  { %50 = vadd.xlane.f32.xlu1 %v48_v10  ;;  %v41_v11 = vpop.xlane.xlu0 %40 }
  0x88   :  { %v43_v12 = vmul.f32 0.03125, %v41_v11 }
  0x8a   :  { %v45_v13 = vsub.f32 %v32_v4, %v43_v12 }
  0x8c   :  { %v260_v14 = vsel %vm35_vm0, %v45_v13, 0.0 }
  0x8d   :  { %v49_v15 = vmul.f32 %v260_v14, %v260_v14 }
  0x8f   :  { %52 = vadd.xlane.f32.xlu1 %v49_v15 }
  0xfa   :  { %v51_v23 = vpop.xlane.xlu1 %50 }
  0xfb   :  { %v61_v24 = vmul.f32 %v60_v22, %v51_v23 }
  0xfd   :  { %161 = vrsqrt.f32 %v61_v24  ;;  %vm70_vm2 = vcmp.eq.f32.partialorder %v61_v24, inf  ;;  %v73_v37 = vand.u32 2147483648, %v61_v24  ;;  %vm72_vm3 = vcmp.eq.f32.partialorder %v61_v24, 0.0 }
 0x102   :  { %v53_v25 = vpop.xlane.xlu1 %52 }
 0x103   :  { %v162_v26 = vpop.eup %161  ;;  %v62_v27 = vmul.f32 %v60_v22, %v53_v25 }
 0x104   :  { %v64_v28 = vmul.f32 %v162_v26, %v61_v24 }
 0x105   :  { %163 = vrsqrt.f32 %v62_v27  ;;  %vm82_vm4 = vcmp.eq.f32.partialorder %v62_v27, inf  ;;  %v85_v45 = vand.u32 2147483648, %v62_v27  ;;  %vm84_vm5 = vcmp.eq.f32.partialorder %v62_v27, 0.0 }
 0x106   :  { %v65_v29 = vmul.f32 %v162_v26, %v64_v28 }
 0x108   :  { %v66_v30 = vmul.f32 0.5, %v65_v29 }
 0x10a   :  { %v67_v31 = vsub.f32 1.5, %v66_v30 }
 0x10b   :  { %v164_v32 = vpop.eup %163 }
 0x10c   :  { %v68_v33 = vmul.f32 %v162_v26, %v67_v31  ;;  %v76_v34 = vmul.f32 %v164_v32, %v62_v27 }
 0x10e   :  { %v69_v35 = vmul.f32 %v68_v33, %v61_v24  ;;  %v77_v36 = vmul.f32 %v164_v32, %v76_v34 }
 0x110   :  { %v71_v38 = vsel %vm70_vm2, %v61_v24, %v69_v35  ;;  %v78_v39 = vmul.f32 0.5, %v77_v36 }
 0x111   :  { %v74_v40 = vsel %vm72_vm3, %v73_v37, %v71_v38 }
 0x112   :  { %v87_v41 = vadd.f32 1e-06, %v74_v40  ;;  %v79_v42 = vsub.f32 1.5, %v78_v39 }
 0x114   :  { %165 = vrcp.f32 %v87_v41  ;;  %v80_v43 = vmul.f32 %v164_v32, %v79_v42  ;;  %v100_v52 = vand.u32 2147483648, %v87_v41  ;;  %v98_v54 = vand.u32 2147483647, %v87_v41 }
 0x115   :  { %vm94_vm7 = vweird.f32 %v87_v41 }
 0x116   :  { %v81_v44 = vmul.f32 %v80_v43, %v62_v27  ;;  %v101_v57 = vor.u32 1.1754944e-38, %v100_v52  ;;  %vm99_vm9 = vcmp.eq.f32.partialorder %v98_v54, 8.507059e+37 }
 0x118   :  { %v83_v46 = vsel %vm82_vm4, %v62_v27, %v81_v44 }
 0x119   :  { %v86_v47 = vsel %vm84_vm5, %v85_v45, %v83_v46 }
 0x11a   :  { %v166_v48 = vpop.eup %165  ;;  %v88_v49 = vadd.f32 1e-06, %v86_v47 }
 0x11b   :  { %v90_v50 = vmul.f32 %v166_v48, %v87_v41  ;;  %vm95_vm6 = vweird.f32 %v166_v48 }
 0x11c   :  { %167 = vrcp.f32 %v88_v49  ;;  %vm96_vm8 = vmor %vm94_vm7, %vm95_vm6  ;;  %v114_v1 = vand.u32 2147483648, %v88_v49  ;;  %v112_v3 = vand.u32 2147483647, %v88_v49  ;;  %vm108_vm11 = vweird.f32 %v88_v49 }
 0x11d   :  { %v91_v51 = vsub.f32 1.0, %v90_v50 }
 0x11e   :  { %v115_v7 = vor.u32 1.1754944e-38, %v114_v1  ;;  %vm113_vm13 = vcmp.eq.f32.partialorder %v112_v3, 8.507059e+37 }
 0x11f   :  { %v92_v53 = vmul.f32 %v166_v48, %v91_v51 }
 0x121   :  { %v93_v55 = vadd.f32 %v166_v48, %v92_v53 }
 0x122   :  { %v168_v56 = vpop.eup %167 }
 0x123   :  { %v97_v58 = vsel %vm96_vm8, %v166_v48, %v93_v55  ;;  %v104_v59 = vmul.f32 %v168_v56, %v88_v49  ;;  %vm109_vm10 = vweird.f32 %v168_v56 }
 0x124   :  { %v102_v61 = vsel %vm99_vm9, %v101_v57, %v97_v58  ;;  %vm110_vm12 = vmor %vm108_vm11, %vm109_vm10 }
 0x125   :  { %v105_v62 = vsub.f32 1.0, %v104_v59  ;;  %v117_v63 = vmul.f32 %v102_v61, %v255_v9 }
 0x127   :  { %v106_v2 = vmul.f32 %v168_v56, %v105_v62  ;;  %v123_v4 = vmul.f32 %v157_v60, %v117_v63 }
 0x129   :  { %v107_v5 = vadd.f32 %v168_v56, %v106_v2  ;;  %v129_v6 = vadd.f32 %v158_v0, %v123_v4 }
 0x12b   :  { %v111_v8 = vsel %vm110_vm12, %v168_v56, %v107_v5  ;;  %131 = vst [vmem:[#allocation5] sm:$0xff] %v129_v6 }
 0x12c   :  { %v116_v10 = vsel %vm113_vm13, %v115_v7, %v111_v8 }
 0x12d   :  { %v118_v9 = vmul.f32 %v116_v10, %v260_v14 }
 0x12f   :  { %v124_v11 = vmul.f32 %v157_v60, %v118_v9 }
 0x131   :  { %v130_v12 = vadd.f32 %v158_v0, %v124_v11 }
 0x133   :  { %132 = vst [vmem:[#allocation5 + $0x8] sm:$0xff] %v130_v12 }
 0x134   :  { %145 = dma.vmem_to_hbm [thread:$0]  %s138_s22, 256, %s140_s24, [#allocation4], %s222_s17, %s222_s17, %s223_s18  }
 0x135   :  { %219 = dma.done.wait [#allocation4], 256  }
 0x136   :  { %220 = vsyncadd [#allocation4], 4294967040 }
 0x137   :  { %150 = vsyncpa [#allocation3], 1 }
 0x138   :  { %151 = vsyncpa [#allocation4], 1 }

</bundles_post_ra>
